<compile_context>
chip_gen: v7x
topology: tpu7x:2x2x1
jax: 0.10.0
libtpu: 0.0.40
codegen_flags: <defaults>
</compile_context>

<pallas_src>
import math

import jax
import jax.numpy as jnp
from jax.experimental import pallas as pl
from jax.experimental.pallas import tpu as pltpu


# Lane tile along the flattened spatial axis (multiple of 128 -> lane-dense).
_LANE_TILE = 32 * 1024


def _sentinel2_scale_kernel(scale_ref, x_ref, o_ref):
    x = x_ref[...]
    if not jnp.issubdtype(x_ref.dtype, jnp.floating):
        # Raw integer DNs: promote once; PyTorch's `/ 4000.0` also yields floats.
        x = x.astype(o_ref.dtype)
    # (C, 1) scale column broadcasts over lanes inside the multiply (VPU-only,
    # fused multiply + clamp; store is unmasked for interior lane-dense tiles).
    o_ref[...] = jnp.clip(x * scale_ref[...], 0.0, 1.0).astype(o_ref.dtype)


def sentinel2_scale(x):
    """Pallas implementation of Sentinel2Scale.forward.

    Every slice along dim 0 is divided by 4000, except index 10 which is
    divided by 100; the result is clamped to [0, 1].  Note: for 4-D inputs the
    special index 10 is along dim 0 (the batch dim), exactly as the PyTorch
    module's `X[:][10]` does.
    """
    orig_shape = x.shape
    d0 = orig_shape[0]
    rest = int(math.prod(orig_shape[1:])) if len(orig_shape) > 1 else 1
    x2d = x.reshape(d0, rest)

    # PyTorch returns floats even for integer inputs (true division).
    out_dtype = x.dtype if jnp.issubdtype(x.dtype, jnp.floating) else jnp.float32

    # Per-band reciprocal scale, computed once outside the kernel: band 10 ->
    # 1/100, every other index along dim 0 -> 1/4000.
    band = jnp.arange(d0, dtype=jnp.int32)[:, None]
    scale = jnp.where(band == 10, 1.0 / 100.0, 1.0 / 4000.0).astype(out_dtype)

    # Tile the lane axis.  tile is either a multiple of 128 (unmasked interior
    # stores) or the full lane extent (small inputs); the ragged final block is
    # masked by Pallas, so no wrapper-side pad/slice copies are needed.
    tile = rest if rest < _LANE_TILE else _LANE_TILE
    grid = (pl.cdiv(rest, tile),)

    data_block = pl.BlockSpec((d0, tile), lambda i: (0, i),
                              memory_space=pltpu.MemorySpace.VMEM)
    scale_block = pl.BlockSpec((d0, 1), lambda i: (0, 0),
                               memory_space=pltpu.MemorySpace.VMEM)

    out2d = pl.pallas_call(
        _sentinel2_scale_kernel,
        out_shape=jax.ShapeDtypeStruct((d0, rest), out_dtype),
        grid=grid,
        in_specs=[scale_block, data_block],
        out_specs=data_block,
        # Elementwise in-place update: reuse the input HBM buffer when dtypes
        # match (avoids a second multi-GB allocation for real Sentinel-2 tiles).
        input_output_aliases=({1: 0} if x2d.dtype == out_dtype else {}),
        compiler_params=pltpu.CompilerParams(
            # Spatial tiles are independent -> shard across v7x's 2 TensorCores.
            dimension_semantics=("parallel",),
        ),
    )(scale, x2d)

    return out2d.reshape(orig_shape)


if __name__ == "__main__":
    # Sentinel-2 has 13 spectral bands; use (C=13, H=16, W=16) so index 10 along
    # dim 0 is a real band (matches the 3-D branch of the PyTorch module).
    key = jax.random.PRNGKey(0)
    x = jax.random.uniform(key, (13, 16, 16), dtype=jnp.float32,
                           minval=0.0, maxval=10000.0)

    # Pure-JAX reference, computed before the (possibly aliased) kernel call.
    ref = x / 4000.0
    ref = ref.at[10].set(ref[10] * 4000.0 / 100.0)
    ref = jnp.clip(ref, 0.0, 1.0)

    y = jax.jit(sentinel2_scale)(x)
    y = jax.block_until_ready(y)

    assert y.dtype == ref.dtype, "output dtype mismatch"
    assert y.shape == ref.shape, "output shape mismatch"
    assert jnp.allclose(y, ref, atol=1e-6, rtol=1e-6), "mismatch vs reference"
    print("KERNEL_OK")
</pallas_src>

<mosaic_0001>
module attributes {stable_mosaic.version = 11 : i64} {
  func.func @_sentinel2_scale_kernel(%arg0: i32, %arg1: memref<13x1xf32, #tpu.memory_space<vmem>>, %arg2: memref<13x256xf32, #tpu.memory_space<vmem>>, %arg3: memref<13x256xf32, #tpu.memory_space<vmem>>) attributes {dimension_semantics = [#tpu.dimension_semantics<parallel>], iteration_bounds = array<i64: 1>, scalar_prefetch = 0 : i64, scratch_operands = 0 : i64, tpu.core_type = #tpu.core_type<tc>, window_params = [{pipeline_mode = #tpu.pipeline_mode<synchronous>, transform_indices = @transform_0, window_bounds = array<i64: 13, 1>}, {transform_indices = @transform_1, window_bounds = array<i64: 13, 256>}, {transform_indices = @transform_2, window_bounds = array<i64: 13, 256>}]} {
    %c0 = arith.constant 0 : index
    %c0_0 = arith.constant 0 : index
    %0 = vector.load %arg2[%c0, %c0_0] : memref<13x256xf32, #tpu.memory_space<vmem>>, vector<13x256xf32>
    %c0_1 = arith.constant 0 : index
    %c0_2 = arith.constant 0 : index
    %1 = vector.load %arg1[%c0_1, %c0_2] : memref<13x1xf32, #tpu.memory_space<vmem>>, vector<13x1xf32>
    %2 = vector.broadcast %1 : vector<13x1xf32> to vector<13x256xf32>
    %3 = arith.mulf %0, %2 : vector<13x256xf32>
    %cst = arith.constant 0.000000e+00 : f32
    %cst_3 = arith.constant 1.000000e+00 : f32
    %4 = vector.broadcast %cst : f32 to vector<13x256xf32>
    %5 = arith.maximumf %4, %3 : vector<13x256xf32>
    %6 = vector.broadcast %cst_3 : f32 to vector<13x256xf32>
    %7 = arith.minimumf %6, %5 : vector<13x256xf32>
    %c0_4 = arith.constant 0 : index
    %c0_5 = arith.constant 0 : index
    %8 = vector.load %arg3[%c0_4, %c0_5] : memref<13x256xf32, #tpu.memory_space<vmem>>, vector<13x256xf32>
    tpu.vector_store %arg3[%c0_4, %c0_5], %7 {strides = array<i32>} : memref<13x256xf32, #tpu.memory_space<vmem>>, vector<13x256xf32>,
    return
  }
  func.func @transform_0(%arg0: i32) -> (i32, i32) {
    %c0_i32 = arith.constant 0 : i32
    %c0_i32_0 = arith.constant 0 : i32
    %c0_i32_1 = arith.constant 0 : i32
    return %c0_i32, %c0_i32_0 : i32, i32
  }
  func.func @transform_1(%arg0: i32) -> (i32, i32) {
    %c0_i32 = arith.constant 0 : i32
    %c0_i32_0 = arith.constant 0 : i32
    return %c0_i32, %arg0 : i32, i32
  }
  func.func @transform_2(%arg0: i32) -> (i32, i32) {
    %c0_i32 = arith.constant 0 : i32
    %c0_i32_0 = arith.constant 0 : i32
    return %c0_i32, %arg0 : i32, i32
  }
}

</mosaic_0001>

<bundles_post_ra>
// kernel: sentinel2_scale.1
= control target key start
LH: loop header
LB: loop body
LE: loop exit
PB: predicated region body
PF: predicated region fallthrough
CT: control target
= control target key end

     0   :  { %v49_v0 = vmov 0   ;;  %s95_s0 = inlined_call_operand.vmem [shape: f32[13,1], index: 0, kind: input, shape index: {}]   ;;  %s96_s1 = inlined_call_operand.vmem [shape: f32[13,256], index: 1, kind: input, shape index: {}, may-alias: {1,2}]   ;;  %s97_s2 = inlined_call_operand.vmem [shape: f32[13,256], index: 2, kind: output, shape index: {}, may-alias: {1,2}]  }
   0x1   :  { %48 = vset.pattern.permute.xlu0 %v49_v0  ;;  %v15_v1 = vld [vmem:[%s95_s0] sm:$0xff]  ;;  %v16_v2 = vld [vmem:[%s95_s0 + $0x8] sm:$0x1f]  ;;  %v13_v8 = vld [vmem:[%s96_s1 + $0x10] sm:$0x1f] }
   0x2   :  { %19 = vperm.xlu0 %48, %v15_v1   ;;  %v11_v3 = vld [vmem:[%s96_s1] sm:$0xff]  ;;  %v12_v4 = vld [vmem:[%s96_s1 + $0x8] sm:$0xff]  ;;  %v14_v9 = vld [vmem:[%s96_s1 + $0x18] sm:$0x1f] }
   0x6   :  { %24 = vperm.xlu0 %48, %v16_v2  }
  0x81   :  { %v20_v5 = vpop.permute.xlu0 %19 }
  0x82   :  { %v27_v6 = vmul.f32 %v20_v5, %v11_v3  ;;  %v28_v7 = vmul.f32 %v20_v5, %v12_v4 }
  0x84   :  { %v31_v10 = vmax.f32 %v27_v6, 0.0  ;;  %v32_v11 = vmax.f32 %v28_v7, 0.0 }
  0x85   :  { %v25_v12 = vpop.permute.xlu0 %24 }
  0x86   :  { %v35_v13 = vmin.f32 %v31_v10, 1.0  ;;  %v36_v14 = vmin.f32 %v32_v11, 1.0  ;;  %v29_v15 = vmul.f32 %v25_v12, %v13_v8  ;;  %v30_v16 = vmul.f32 %v25_v12, %v14_v9 }
  0x88   :  { %39 = vst [vmem:[%s97_s2] sm:$0xff] %v35_v13  ;;  %40 = vst [vmem:[%s97_s2 + $0x8] sm:$0xff] %v36_v14  ;;  %v33_v17 = vmax.f32 %v29_v15, 0.0  ;;  %v34_v18 = vmax.f32 %v30_v16, 0.0 }
  0x8a   :  { %v37_v19 = vmin.f32 %v33_v17, 1.0  ;;  %v38_v20 = vmin.f32 %v34_v18, 1.0 }
  0x8c   :  { %41 = vst [vmem:[%s97_s2 + $0x10] sm:$0x1f] %v37_v19  ;;  %42 = vst [vmem:[%s97_s2 + $0x18] sm:$0x1f] %v38_v20 }

</bundles_post_ra>
